<compile_context>
chip_gen: v7x
topology: tpu7x:2x2x1
jax: 0.10.0
libtpu: 0.0.40
codegen_flags: <defaults>
</compile_context>

<pallas_src>
import jax
import jax.numpy as jnp
from jax.experimental import pallas as pl
from jax.experimental.pallas import tpu as pltpu


LANE = 128     # lane width (last-dim tiling unit)
SUBLANE = 8    # f32 sublane width (second-to-last dim tiling unit)


def _round_up(x, m):
    return ((x + m - 1) // m) * m


def _logreg_kernel(ids_ref, lens_ref, table_ref, w_pre_ref, w_post_ref, b_ref,
                   o_ref):
    """One batch tile: fused embedding-mean -> split linear -> log_softmax.

    ids_ref : (2*tb, L) int32   rows [0:tb] = pre ids, rows [tb:2tb] = post ids
    lens_ref: (2*tb, 1) float32 matching lengths (padded rows carry 1.0)
    table   : (Vp, E)  bf16     vocab zero-padded to a multiple of 128
    w_pre   : (E, Cp)  bf16     w_post: (E, Cp) bf16    b: (1, Cp) f32
    o_ref   : (tb, Cp) f32      log-probs (padded classes ~ -1e9 -> -inf-ish)
    """
    n_rows, seq_len = ids_ref.shape
    tb = n_rows // 2
    vp = table_ref.shape[0]

    # --- token counts: 2-D accumulation, fully unrolled over L (no 3-D one-hot) ---
    vocab_iota = jax.lax.broadcasted_iota(jnp.int32, (n_rows, vp), 1)
    counts = jnp.zeros((n_rows, vp), jnp.float32)
    for l in range(seq_len):                       # static -> fully unrolled
        tok = ids_ref[:, l:l + 1]                  # (n_rows, 1) static lane load
        counts = counts + (tok == vocab_iota).astype(jnp.float32)

    # --- gather + sequence-sum as one MXU matmul:
    #       sum_l table[ids[b, l]]  ==  counts[b, :] @ table
    summed = jnp.dot(counts.astype(table_ref.dtype), table_ref[...],
                     preferred_element_type=jnp.float32)            # (2*tb, E)
    means = summed / lens_ref[...]                                   # exact divide

    pre = means[:tb]                                                 # static sublane slices
    post = means[tb:]

    # cat([pre, post], 1) @ W.T + b  ==  pre @ W_pre + post @ W_post + b
    logit = (jnp.dot(pre.astype(w_pre_ref.dtype), w_pre_ref[...],
                     preferred_element_type=jnp.float32)
             + jnp.dot(post.astype(w_post_ref.dtype), w_post_ref[...],
                       preferred_element_type=jnp.float32)
             + b_ref[...])                                           # (tb, Cp)

    # log_softmax over classes (padded classes carry a -1e9 bias -> exp() == 0)
    m = jnp.max(logit, axis=1, keepdims=True)
    shifted = logit - m
    lse = jnp.log(jnp.sum(jnp.exp(shifted), axis=1, keepdims=True))
    o_ref[...] = shifted - lse


def logistic_regression_forward(embed_table, weight, bias,
                                data_pre, data_post, len_pre, len_post,
                                *, batch_tile=128):
    """weight: (num_class, 2*embed_dim) torch layout; bias: (num_class,)."""
    vocab, embed_dim = embed_table.shape
    num_class = weight.shape[0]
    batch, seq_len = data_pre.shape

    # --- parameter prep (once, outside the hot path) ---
    cp = _round_up(num_class, LANE)                 # lane-dense class dim
    vp = _round_up(vocab, LANE)                     # lane-dense vocab (MXU K dim)
    w_t = weight.T.astype(jnp.bfloat16)             # (2E, C)
    w_pre = jnp.zeros((embed_dim, cp), jnp.bfloat16).at[:, :num_class].set(w_t[:embed_dim])
    w_post = jnp.zeros((embed_dim, cp), jnp.bfloat16).at[:, :num_class].set(w_t[embed_dim:])
    b_row = jnp.full((1, cp), -1e9, jnp.float32).at[0, :num_class].set(
        bias.astype(jnp.float32))
    table = jnp.zeros((vp, embed_dim), jnp.bfloat16).at[:vocab].set(
        embed_table.astype(jnp.bfloat16))

    # --- batch tiling: pre/post stacked per tile so each grid step sees 2*tb rows ---
    tb = min(batch_tile, _round_up(batch, SUBLANE))
    bp = _round_up(batch, tb)
    nt = bp // tb

    def pad_ids(x):
        return jnp.pad(x.astype(jnp.int32), ((0, bp - batch), (0, 0)))

    def pad_len(l):
        l = l.astype(jnp.float32).reshape(batch, 1)
        return jnp.pad(l, ((0, bp - batch), (0, 0)), constant_values=1.0)

    ids = jnp.stack([pad_ids(data_pre).reshape(nt, tb, seq_len),
                     pad_ids(data_post).reshape(nt, tb, seq_len)],
                    axis=1).reshape(nt * 2 * tb, seq_len)            # (nt*2*tb, L)
    lens = jnp.stack([pad_len(len_pre).reshape(nt, tb, 1),
                      pad_len(len_post).reshape(nt, tb, 1)],
                     axis=1).reshape(nt * 2 * tb, 1)                 # (nt*2*tb, 1)

    # --- VMEM budget: resident params + double-buffered tiles + working set ---
    param_bytes = table.size * 2 + w_pre.size * 2 + w_post.size * 2 + b_row.size * 4
    tile_bytes = 2 * (2 * tb * seq_len * 4 + 2 * tb * 4 + tb * cp * 4)
    work_bytes = 2 * tb * vp * 4 + 4 * tb * embed_dim * 4 + 4 * tb * cp * 4
    needed = int(1.5 * (param_bytes + tile_bytes + work_bytes)) + (8 << 20)
    try:
        phys = getattr(pltpu.get_tpu_info(), "vmem_capacity_bytes", 64 << 20)
    except Exception:
        phys = 64 << 20                             # conservative (v7x per-TC)
    vmem_limit = int(min(int(phys * 0.85), max(needed, 32 << 20)))

    def _run(single_buffer_consts):
        const_kw = ({"pipeline_mode": pl.Buffered(1)}
                    if single_buffer_consts else {})

        def const_spec(shape):
            return pl.BlockSpec(shape, lambda i: (0, 0), **const_kw)

        return pl.pallas_call(
            _logreg_kernel,
            out_shape=jax.ShapeDtypeStruct((bp, cp), jnp.float32),
            grid=(nt,),
            in_specs=[
                pl.BlockSpec((2 * tb, seq_len), lambda i: (i, 0)),   # stacked ids
                pl.BlockSpec((2 * tb, 1), lambda i: (i, 0)),         # stacked lengths
                const_spec((vp, embed_dim)),                         # embedding table
                const_spec((embed_dim, cp)),                         # W_pre
                const_spec((embed_dim, cp)),                         # W_post
                const_spec((1, cp)),                                 # bias row
            ],
            out_specs=pl.BlockSpec((tb, cp), lambda i: (i, 0)),
            compiler_params=pltpu.CompilerParams(
                dimension_semantics=("parallel",),
                vmem_limit_bytes=vmem_limit),
        )(ids, lens, table, w_pre, w_post, b_row)

    try:
        out = _run(single_buffer_consts=True)
    except Exception:
        # If this jax build rejects pipeline_mode=pl.Buffered(1), fall back to
        # the default double-buffered constants (functionally identical, just
        # 2x the resident-parameter VMEM footprint).
        out = _run(single_buffer_consts=False)

    return out[:batch, :num_class]


if __name__ == "__main__":
    vocab_size = 50
    embed_dim = 16
    num_class = 4
    B, L = 4, 8

    key = jax.random.PRNGKey(0)
    k_emb, k_w, k_b, k_pre, k_post, k_lpre, k_lpost = jax.random.split(key, 7)

    # nn.Embedding default: standard normal; linear: xavier_normal_ weight, uniform_ bias.
    embed_table = jax.random.normal(k_emb, (vocab_size, embed_dim), dtype=jnp.float32)
    fan_in, fan_out = 2 * embed_dim, num_class
    std = (2.0 / (fan_in + fan_out)) ** 0.5
    W = std * jax.random.normal(k_w, (num_class, 2 * embed_dim), dtype=jnp.float32)
    b = jax.random.uniform(k_b, (num_class,), dtype=jnp.float32)

    data_pre = jax.random.randint(k_pre, (B, L), 0, vocab_size, dtype=jnp.int32)
    data_post = jax.random.randint(k_post, (B, L), 0, vocab_size, dtype=jnp.int32)
    len_pre = jax.random.randint(k_lpre, (B,), 1, L + 1, dtype=jnp.int32)
    len_post = jax.random.randint(k_lpost, (B,), 1, L + 1, dtype=jnp.int32)

    log_probs = logistic_regression_forward(embed_table, W, b,
                                            data_pre, data_post, len_pre, len_post)
    jax.block_until_ready(log_probs)

    # Plain-JAX reference, using the same bf16-rounded params the kernel consumes.
    table_q = embed_table.astype(jnp.bfloat16).astype(jnp.float32)
    W_q = W.astype(jnp.bfloat16).astype(jnp.float32)
    ep = jnp.take(table_q, data_pre, axis=0).sum(axis=1) / len_pre.astype(jnp.float32)[:, None]
    eo = jnp.take(table_q, data_post, axis=0).sum(axis=1) / len_post.astype(jnp.float32)[:, None]
    logit = jnp.concatenate([ep, eo], axis=1) @ W_q.T + b
    ref = jax.nn.log_softmax(logit, axis=1)

    assert log_probs.shape == (B, num_class)
    # Tolerance covers bf16 MXU operands (table, W, means cast).
    assert jnp.allclose(log_probs, ref, atol=3e-2, rtol=3e-2), "mismatch vs reference"

    print("KERNEL_OK")
</pallas_src>

<mosaic_0001>
module attributes {stable_mosaic.version = 11 : i64} {
  func.func @_logreg_kernel(%arg0: i32, %arg1: memref<16x8xi32, #tpu.memory_space<vmem>>, %arg2: memref<16x1xf32, #tpu.memory_space<vmem>>, %arg3: memref<128x16xbf16, #tpu.memory_space<vmem>>, %arg4: memref<16x128xbf16, #tpu.memory_space<vmem>>, %arg5: memref<16x128xbf16, #tpu.memory_space<vmem>>, %arg6: memref<1x128xf32, #tpu.memory_space<vmem>>, %arg7: memref<8x128xf32, #tpu.memory_space<vmem>>) attributes {dimension_semantics = [#tpu.dimension_semantics<parallel>], iteration_bounds = array<i64: 1>, scalar_prefetch = 0 : i64, scratch_operands = 0 : i64, tpu.core_type = #tpu.core_type<tc>, window_params = [{transform_indices = @transform_0, window_bounds = array<i64: 16, 8>}, {transform_indices = @transform_1, window_bounds = array<i64: 16, 1>}, {pipeline_mode = #tpu.pipeline_mode<synchronous>, transform_indices = @transform_2, window_bounds = array<i64: 128, 16>}, {pipeline_mode = #tpu.pipeline_mode<synchronous>, transform_indices = @transform_3, window_bounds = array<i64: 16, 128>}, {pipeline_mode = #tpu.pipeline_mode<synchronous>, transform_indices = @transform_4, window_bounds = array<i64: 16, 128>}, {pipeline_mode = #tpu.pipeline_mode<synchronous>, transform_indices = @transform_5, window_bounds = array<i64: 1, 128>}, {transform_indices = @transform_6, window_bounds = array<i64: 8, 128>}]} {
    %0 = tpu.iota {dimensions = array<i32: 1>} : vector<16x128xi32>
    %cst = arith.constant 0.000000e+00 : f32
    %1 = vector.broadcast %cst : f32 to vector<16x128xf32>
    %c0 = arith.constant 0 : index
    %c0_0 = arith.constant 0 : index
    %2 = vector.load %arg1[%c0, %c0_0] : memref<16x8xi32, #tpu.memory_space<vmem>>, vector<16x1xi32>
    %3 = vector.broadcast %2 : vector<16x1xi32> to vector<16x128xi32>
    %4 = arith.cmpi eq, %3, %0 : vector<16x128xi32>
    %5 = arith.extui %4 : vector<16x128xi1> to vector<16x128xi32>
    %6 = arith.sitofp %5 : vector<16x128xi32> to vector<16x128xf32>
    %7 = arith.addf %1, %6 : vector<16x128xf32>
    %c0_1 = arith.constant 0 : index
    %c1 = arith.constant 1 : index
    %8 = vector.load %arg1[%c0_1, %c1] : memref<16x8xi32, #tpu.memory_space<vmem>>, vector<16x1xi32>
    %9 = vector.broadcast %8 : vector<16x1xi32> to vector<16x128xi32>
    %10 = arith.cmpi eq, %9, %0 : vector<16x128xi32>
    %11 = arith.extui %10 : vector<16x128xi1> to vector<16x128xi32>
    %12 = arith.sitofp %11 : vector<16x128xi32> to vector<16x128xf32>
    %13 = arith.addf %7, %12 : vector<16x128xf32>
    %c0_2 = arith.constant 0 : index
    %c2 = arith.constant 2 : index
    %14 = vector.load %arg1[%c0_2, %c2] : memref<16x8xi32, #tpu.memory_space<vmem>>, vector<16x1xi32>
    %15 = vector.broadcast %14 : vector<16x1xi32> to vector<16x128xi32>
    %16 = arith.cmpi eq, %15, %0 : vector<16x128xi32>
    %17 = arith.extui %16 : vector<16x128xi1> to vector<16x128xi32>
    %18 = arith.sitofp %17 : vector<16x128xi32> to vector<16x128xf32>
    %19 = arith.addf %13, %18 : vector<16x128xf32>
    %c0_3 = arith.constant 0 : index
    %c3 = arith.constant 3 : index
    %20 = vector.load %arg1[%c0_3, %c3] : memref<16x8xi32, #tpu.memory_space<vmem>>, vector<16x1xi32>
    %21 = vector.broadcast %20 : vector<16x1xi32> to vector<16x128xi32>
    %22 = arith.cmpi eq, %21, %0 : vector<16x128xi32>
    %23 = arith.extui %22 : vector<16x128xi1> to vector<16x128xi32>
    %24 = arith.sitofp %23 : vector<16x128xi32> to vector<16x128xf32>
    %25 = arith.addf %19, %24 : vector<16x128xf32>
    %c0_4 = arith.constant 0 : index
    %c4 = arith.constant 4 : index
    %26 = vector.load %arg1[%c0_4, %c4] : memref<16x8xi32, #tpu.memory_space<vmem>>, vector<16x1xi32>
    %27 = vector.broadcast %26 : vector<16x1xi32> to vector<16x128xi32>
    %28 = arith.cmpi eq, %27, %0 : vector<16x128xi32>
    %29 = arith.extui %28 : vector<16x128xi1> to vector<16x128xi32>
    %30 = arith.sitofp %29 : vector<16x128xi32> to vector<16x128xf32>
    %31 = arith.addf %25, %30 : vector<16x128xf32>
    %c0_5 = arith.constant 0 : index
    %c5 = arith.constant 5 : index
    %32 = vector.load %arg1[%c0_5, %c5] : memref<16x8xi32, #tpu.memory_space<vmem>>, vector<16x1xi32>
    %33 = vector.broadcast %32 : vector<16x1xi32> to vector<16x128xi32>
    %34 = arith.cmpi eq, %33, %0 : vector<16x128xi32>
    %35 = arith.extui %34 : vector<16x128xi1> to vector<16x128xi32>
    %36 = arith.sitofp %35 : vector<16x128xi32> to vector<16x128xf32>
    %37 = arith.addf %31, %36 : vector<16x128xf32>
    %c0_6 = arith.constant 0 : index
    %c6 = arith.constant 6 : index
    %38 = vector.load %arg1[%c0_6, %c6] : memref<16x8xi32, #tpu.memory_space<vmem>>, vector<16x1xi32>
    %39 = vector.broadcast %38 : vector<16x1xi32> to vector<16x128xi32>
    %40 = arith.cmpi eq, %39, %0 : vector<16x128xi32>
    %41 = arith.extui %40 : vector<16x128xi1> to vector<16x128xi32>
    %42 = arith.sitofp %41 : vector<16x128xi32> to vector<16x128xf32>
    %43 = arith.addf %37, %42 : vector<16x128xf32>
    %c0_7 = arith.constant 0 : index
    %c7 = arith.constant 7 : index
    %44 = vector.load %arg1[%c0_7, %c7] : memref<16x8xi32, #tpu.memory_space<vmem>>, vector<16x1xi32>
    %45 = vector.broadcast %44 : vector<16x1xi32> to vector<16x128xi32>
    %46 = arith.cmpi eq, %45, %0 : vector<16x128xi32>
    %47 = arith.extui %46 : vector<16x128xi1> to vector<16x128xi32>
    %48 = arith.sitofp %47 : vector<16x128xi32> to vector<16x128xf32>
    %49 = arith.addf %43, %48 : vector<16x128xf32>
    %50 = arith.truncf %49 : vector<16x128xf32> to vector<16x128xbf16>
    %c0_8 = arith.constant 0 : index
    %c0_9 = arith.constant 0 : index
    %51 = vector.load %arg3[%c0_8, %c0_9] : memref<128x16xbf16, #tpu.memory_space<vmem>>, vector<128x16xbf16>
    %cst_10 = arith.constant dense<0.000000e+00> : vector<16x16xf32>
    %52 = tpu.matmul %50, %51, %cst_10 {dimension_numbers = #tpu.dot_dimension_numbers<[1], [0], [0], [1], [0, 0, 1, 1], [], []>} : vector<16x128xbf16>, vector<128x16xbf16>, vector<16x16xf32> -> vector<16x16xf32>
    %c0_11 = arith.constant 0 : index
    %c0_12 = arith.constant 0 : index
    %53 = vector.load %arg2[%c0_11, %c0_12] : memref<16x1xf32, #tpu.memory_space<vmem>>, vector<16x1xf32>
    %54 = vector.broadcast %53 : vector<16x1xf32> to vector<16x16xf32>
    %55 = arith.divf %52, %54 : vector<16x16xf32>
    %56 = vector.extract_strided_slice %55 {offsets = [0, 0], sizes = [8, 16], strides = [1, 1]} : vector<16x16xf32> to vector<8x16xf32>
    %57 = vector.extract_strided_slice %55 {offsets = [8, 0], sizes = [8, 16], strides = [1, 1]} : vector<16x16xf32> to vector<8x16xf32>
    %58 = arith.truncf %56 : vector<8x16xf32> to vector<8x16xbf16>
    %c0_13 = arith.constant 0 : index
    %c0_14 = arith.constant 0 : index
    %59 = vector.load %arg4[%c0_13, %c0_14] : memref<16x128xbf16, #tpu.memory_space<vmem>>, vector<16x128xbf16>
    %cst_15 = arith.constant dense<0.000000e+00> : vector<8x128xf32>
    %60 = tpu.matmul %58, %59, %cst_15 {dimension_numbers = #tpu.dot_dimension_numbers<[1], [0], [0], [1], [0, 0, 1, 1], [], []>} : vector<8x16xbf16>, vector<16x128xbf16>, vector<8x128xf32> -> vector<8x128xf32>
    %61 = arith.truncf %57 : vector<8x16xf32> to vector<8x16xbf16>
    %c0_16 = arith.constant 0 : index
    %c0_17 = arith.constant 0 : index
    %62 = vector.load %arg5[%c0_16, %c0_17] : memref<16x128xbf16, #tpu.memory_space<vmem>>, vector<16x128xbf16>
    %cst_18 = arith.constant dense<0.000000e+00> : vector<8x128xf32>
    %63 = tpu.matmul %61, %62, %cst_18 {dimension_numbers = #tpu.dot_dimension_numbers<[1], [0], [0], [1], [0, 0, 1, 1], [], []>} : vector<8x16xbf16>, vector<16x128xbf16>, vector<8x128xf32> -> vector<8x128xf32>
    %64 = arith.addf %60, %63 : vector<8x128xf32>
    %c0_19 = arith.constant 0 : index
    %c0_20 = arith.constant 0 : index
    %65 = vector.load %arg6[%c0_19, %c0_20] : memref<1x128xf32, #tpu.memory_space<vmem>>, vector<1x128xf32>
    %66 = vector.broadcast %65 : vector<1x128xf32> to vector<8x128xf32>
    %67 = arith.addf %64, %66 : vector<8x128xf32>
    %cst_21 = arith.constant dense<0xFF800000> : vector<8xf32>
    %68 = vector.multi_reduction <maximumf>, %67, %cst_21 [1] : vector<8x128xf32> to vector<8xf32>
    %69 = vector.shape_cast %68 : vector<8xf32> to vector<8x1xf32>
    %70 = vector.broadcast %69 : vector<8x1xf32> to vector<8x128xf32>
    %71 = arith.subf %67, %70 : vector<8x128xf32>
    %72 = math.exp %71 : vector<8x128xf32>
    %cst_22 = arith.constant dense<0.000000e+00> : vector<8xf32>
    %73 = vector.multi_reduction <add>, %72, %cst_22 [1] : vector<8x128xf32> to vector<8xf32>
    %74 = vector.shape_cast %73 : vector<8xf32> to vector<8x1xf32>
    %75 = math.log %74 : vector<8x1xf32>
    %76 = vector.broadcast %75 : vector<8x1xf32> to vector<8x128xf32>
    %77 = arith.subf %71, %76 : vector<8x128xf32>
    %c0_23 = arith.constant 0 : index
    %c0_24 = arith.constant 0 : index
    %78 = vector.load %arg7[%c0_23, %c0_24] : memref<8x128xf32, #tpu.memory_space<vmem>>, vector<8x128xf32>
    tpu.vector_store %arg7[%c0_23, %c0_24], %77 {strides = array<i32>} : memref<8x128xf32, #tpu.memory_space<vmem>>, vector<8x128xf32>,
    return
  }
  func.func @transform_0(%arg0: i32) -> (i32, i32) {
    %c0_i32 = arith.constant 0 : i32
    %c0_i32_0 = arith.constant 0 : i32
    return %arg0, %c0_i32 : i32, i32
  }
  func.func @transform_1(%arg0: i32) -> (i32, i32) {
    %c0_i32 = arith.constant 0 : i32
    %c0_i32_0 = arith.constant 0 : i32
    return %arg0, %c0_i32 : i32, i32
  }
  func.func @transform_2(%arg0: i32) -> (i32, i32) {
    %c0_i32 = arith.constant 0 : i32
    %c0_i32_0 = arith.constant 0 : i32
    %c0_i32_1 = arith.constant 0 : i32
    return %c0_i32, %c0_i32_0 : i32, i32
  }
  func.func @transform_3(%arg0: i32) -> (i32, i32) {
    %c0_i32 = arith.constant 0 : i32
    %c0_i32_0 = arith.constant 0 : i32
    %c0_i32_1 = arith.constant 0 : i32
    return %c0_i32, %c0_i32_0 : i32, i32
  }
  func.func @transform_4(%arg0: i32) -> (i32, i32) {
    %c0_i32 = arith.constant 0 : i32
    %c0_i32_0 = arith.constant 0 : i32
    %c0_i32_1 = arith.constant 0 : i32
    return %c0_i32, %c0_i32_0 : i32, i32
  }
  func.func @transform_5(%arg0: i32) -> (i32, i32) {
    %c0_i32 = arith.constant 0 : i32
    %c0_i32_0 = arith.constant 0 : i32
    %c0_i32_1 = arith.constant 0 : i32
    return %c0_i32, %c0_i32_0 : i32, i32
  }
  func.func @transform_6(%arg0: i32) -> (i32, i32) {
    %c0_i32 = arith.constant 0 : i32
    %c0_i32_0 = arith.constant 0 : i32
    return %arg0, %c0_i32 : i32, i32
  }
}

module attributes {stable_mosaic.version = 11 : i64} {
  func.func @_logreg_kernel(%arg0: i32, %arg1: memref<16x8xi32, #tpu.memory_space<vmem>>, %arg2: memref<16x1xf32, #tpu.memory_space<vmem>>, %arg3: memref<128x16xbf16, #tpu.memory_space<vmem>>, %arg4: memref<16x128xbf16, #tpu.memory_space<vmem>>, %arg5: memref<16x128xbf16, #tpu.memory_space<vmem>>, %arg6: memref<1x128xf32, #tpu.memory_space<vmem>>, %arg7: memref<8x128xf32, #tpu.memory_space<vmem>>) attributes {dimension_semantics = [#tpu.dimension_semantics<parallel>], iteration_bounds = array<i64: 1>, scalar_prefetch = 0 : i64, scratch_operands = 0 : i64, tpu.core_type = #tpu.core_type<tc>, window_params = [{transform_indices = @transform_0, window_bounds = array<i64: 16, 8>}, {transform_indices = @transform_1, window_bounds = array<i64: 16, 1>}, {pipeline_mode = #tpu.pipeline_mode<synchronous>, transform_indices = @transform_2, window_bounds = array<i64: 128, 16>}, {pipeline_mode = #tpu.pipeline_mode<synchronous>, transform_indices = @transform_3, window_bounds = array<i64: 16, 128>}, {pipeline_mode = #tpu.pipeline_mode<synchronous>, transform_indices = @transform_4, window_bounds = array<i64: 16, 128>}, {pipeline_mode = #tpu.pipeline_mode<synchronous>, transform_indices = @transform_5, window_bounds = array<i64: 1, 128>}, {transform_indices = @transform_6, window_bounds = array<i64: 8, 128>}]} {
    %0 = tpu.iota {dimensions = array<i32: 1>} : vector<16x128xi32>
    %cst = arith.constant 0.000000e+00 : f32
    %1 = vector.broadcast %cst : f32 to vector<16x128xf32>
    %c0 = arith.constant 0 : index
    %c0_0 = arith.constant 0 : index
    %2 = vector.load %arg1[%c0, %c0_0] : memref<16x8xi32, #tpu.memory_space<vmem>>, vector<16x1xi32>
    %3 = vector.broadcast %2 : vector<16x1xi32> to vector<16x128xi32>
    %4 = arith.cmpi eq, %3, %0 : vector<16x128xi32>
    %5 = arith.extui %4 : vector<16x128xi1> to vector<16x128xi32>
    %6 = arith.sitofp %5 : vector<16x128xi32> to vector<16x128xf32>
    %7 = arith.addf %1, %6 : vector<16x128xf32>
    %c0_1 = arith.constant 0 : index
    %c1 = arith.constant 1 : index
    %8 = vector.load %arg1[%c0_1, %c1] : memref<16x8xi32, #tpu.memory_space<vmem>>, vector<16x1xi32>
    %9 = vector.broadcast %8 : vector<16x1xi32> to vector<16x128xi32>
    %10 = arith.cmpi eq, %9, %0 : vector<16x128xi32>
    %11 = arith.extui %10 : vector<16x128xi1> to vector<16x128xi32>
    %12 = arith.sitofp %11 : vector<16x128xi32> to vector<16x128xf32>
    %13 = arith.addf %7, %12 : vector<16x128xf32>
    %c0_2 = arith.constant 0 : index
    %c2 = arith.constant 2 : index
    %14 = vector.load %arg1[%c0_2, %c2] : memref<16x8xi32, #tpu.memory_space<vmem>>, vector<16x1xi32>
    %15 = vector.broadcast %14 : vector<16x1xi32> to vector<16x128xi32>
    %16 = arith.cmpi eq, %15, %0 : vector<16x128xi32>
    %17 = arith.extui %16 : vector<16x128xi1> to vector<16x128xi32>
    %18 = arith.sitofp %17 : vector<16x128xi32> to vector<16x128xf32>
    %19 = arith.addf %13, %18 : vector<16x128xf32>
    %c0_3 = arith.constant 0 : index
    %c3 = arith.constant 3 : index
    %20 = vector.load %arg1[%c0_3, %c3] : memref<16x8xi32, #tpu.memory_space<vmem>>, vector<16x1xi32>
    %21 = vector.broadcast %20 : vector<16x1xi32> to vector<16x128xi32>
    %22 = arith.cmpi eq, %21, %0 : vector<16x128xi32>
    %23 = arith.extui %22 : vector<16x128xi1> to vector<16x128xi32>
    %24 = arith.sitofp %23 : vector<16x128xi32> to vector<16x128xf32>
    %25 = arith.addf %19, %24 : vector<16x128xf32>
    %c0_4 = arith.constant 0 : index
    %c4 = arith.constant 4 : index
    %26 = vector.load %arg1[%c0_4, %c4] : memref<16x8xi32, #tpu.memory_space<vmem>>, vector<16x1xi32>
    %27 = vector.broadcast %26 : vector<16x1xi32> to vector<16x128xi32>
    %28 = arith.cmpi eq, %27, %0 : vector<16x128xi32>
    %29 = arith.extui %28 : vector<16x128xi1> to vector<16x128xi32>
    %30 = arith.sitofp %29 : vector<16x128xi32> to vector<16x128xf32>
    %31 = arith.addf %25, %30 : vector<16x128xf32>
    %c0_5 = arith.constant 0 : index
    %c5 = arith.constant 5 : index
    %32 = vector.load %arg1[%c0_5, %c5] : memref<16x8xi32, #tpu.memory_space<vmem>>, vector<16x1xi32>
    %33 = vector.broadcast %32 : vector<16x1xi32> to vector<16x128xi32>
    %34 = arith.cmpi eq, %33, %0 : vector<16x128xi32>
    %35 = arith.extui %34 : vector<16x128xi1> to vector<16x128xi32>
    %36 = arith.sitofp %35 : vector<16x128xi32> to vector<16x128xf32>
    %37 = arith.addf %31, %36 : vector<16x128xf32>
    %c0_6 = arith.constant 0 : index
    %c6 = arith.constant 6 : index
    %38 = vector.load %arg1[%c0_6, %c6] : memref<16x8xi32, #tpu.memory_space<vmem>>, vector<16x1xi32>
    %39 = vector.broadcast %38 : vector<16x1xi32> to vector<16x128xi32>
    %40 = arith.cmpi eq, %39, %0 : vector<16x128xi32>
    %41 = arith.extui %40 : vector<16x128xi1> to vector<16x128xi32>
    %42 = arith.sitofp %41 : vector<16x128xi32> to vector<16x128xf32>
    %43 = arith.addf %37, %42 : vector<16x128xf32>
    %c0_7 = arith.constant 0 : index
    %c7 = arith.constant 7 : index
    %44 = vector.load %arg1[%c0_7, %c7] : memref<16x8xi32, #tpu.memory_space<vmem>>, vector<16x1xi32>
    %45 = vector.broadcast %44 : vector<16x1xi32> to vector<16x128xi32>
    %46 = arith.cmpi eq, %45, %0 : vector<16x128xi32>
    %47 = arith.extui %46 : vector<16x128xi1> to vector<16x128xi32>
    %48 = arith.sitofp %47 : vector<16x128xi32> to vector<16x128xf32>
    %49 = arith.addf %43, %48 : vector<16x128xf32>
    %50 = arith.truncf %49 : vector<16x128xf32> to vector<16x128xbf16>
    %c0_8 = arith.constant 0 : index
    %c0_9 = arith.constant 0 : index
    %51 = vector.load %arg3[%c0_8, %c0_9] : memref<128x16xbf16, #tpu.memory_space<vmem>>, vector<128x16xbf16>
    %cst_10 = arith.constant dense<0.000000e+00> : vector<16x16xf32>
    %52 = tpu.matmul %50, %51, %cst_10 {dimension_numbers = #tpu.dot_dimension_numbers<[1], [0], [0], [1], [0, 0, 1, 1], [], []>} : vector<16x128xbf16>, vector<128x16xbf16>, vector<16x16xf32> -> vector<16x16xf32>
    %c0_11 = arith.constant 0 : index
    %c0_12 = arith.constant 0 : index
    %53 = vector.load %arg2[%c0_11, %c0_12] : memref<16x1xf32, #tpu.memory_space<vmem>>, vector<16x1xf32>
    %54 = vector.broadcast %53 : vector<16x1xf32> to vector<16x16xf32>
    %55 = arith.divf %52, %54 : vector<16x16xf32>
    %56 = vector.extract_strided_slice %55 {offsets = [0, 0], sizes = [8, 16], strides = [1, 1]} : vector<16x16xf32> to vector<8x16xf32>
    %57 = vector.extract_strided_slice %55 {offsets = [8, 0], sizes = [8, 16], strides = [1, 1]} : vector<16x16xf32> to vector<8x16xf32>
    %58 = arith.truncf %56 : vector<8x16xf32> to vector<8x16xbf16>
    %c0_13 = arith.constant 0 : index
    %c0_14 = arith.constant 0 : index
    %59 = vector.load %arg4[%c0_13, %c0_14] : memref<16x128xbf16, #tpu.memory_space<vmem>>, vector<16x128xbf16>
    %cst_15 = arith.constant dense<0.000000e+00> : vector<8x128xf32>
    %60 = tpu.matmul %58, %59, %cst_15 {dimension_numbers = #tpu.dot_dimension_numbers<[1], [0], [0], [1], [0, 0, 1, 1], [], []>} : vector<8x16xbf16>, vector<16x128xbf16>, vector<8x128xf32> -> vector<8x128xf32>
    %61 = arith.truncf %57 : vector<8x16xf32> to vector<8x16xbf16>
    %c0_16 = arith.constant 0 : index
    %c0_17 = arith.constant 0 : index
    %62 = vector.load %arg5[%c0_16, %c0_17] : memref<16x128xbf16, #tpu.memory_space<vmem>>, vector<16x128xbf16>
    %cst_18 = arith.constant dense<0.000000e+00> : vector<8x128xf32>
    %63 = tpu.matmul %61, %62, %cst_18 {dimension_numbers = #tpu.dot_dimension_numbers<[1], [0], [0], [1], [0, 0, 1, 1], [], []>} : vector<8x16xbf16>, vector<16x128xbf16>, vector<8x128xf32> -> vector<8x128xf32>
    %64 = arith.addf %60, %63 : vector<8x128xf32>
    %c0_19 = arith.constant 0 : index
    %c0_20 = arith.constant 0 : index
    %65 = vector.load %arg6[%c0_19, %c0_20] : memref<1x128xf32, #tpu.memory_space<vmem>>, vector<1x128xf32>
    %66 = vector.broadcast %65 : vector<1x128xf32> to vector<8x128xf32>
    %67 = arith.addf %64, %66 : vector<8x128xf32>
    %cst_21 = arith.constant dense<0xFF800000> : vector<8xf32>
    %68 = vector.multi_reduction <maximumf>, %67, %cst_21 [1] : vector<8x128xf32> to vector<8xf32>
    %69 = vector.shape_cast %68 : vector<8xf32> to vector<8x1xf32>
    %70 = vector.broadcast %69 : vector<8x1xf32> to vector<8x128xf32>
    %71 = arith.subf %67, %70 : vector<8x128xf32>
    %72 = math.exp %71 : vector<8x128xf32>
    %cst_22 = arith.constant dense<0.000000e+00> : vector<8xf32>
    %73 = vector.multi_reduction <add>, %72, %cst_22 [1] : vector<8x128xf32> to vector<8xf32>
    %74 = vector.shape_cast %73 : vector<8xf32> to vector<8x1xf32>
    %75 = math.log %74 : vector<8x1xf32>
    %76 = vector.broadcast %75 : vector<8x1xf32> to vector<8x128xf32>
    %77 = arith.subf %71, %76 : vector<8x128xf32>
    %c0_23 = arith.constant 0 : index
    %c0_24 = arith.constant 0 : index
    %78 = vector.load %arg7[%c0_23, %c0_24] : memref<8x128xf32, #tpu.memory_space<vmem>>, vector<8x128xf32>
    tpu.vector_store %arg7[%c0_23, %c0_24], %77 {strides = array<i32>} : memref<8x128xf32, #tpu.memory_space<vmem>>, vector<8x128xf32>,
    return
  }
  func.func @transform_0(%arg0: i32) -> (i32, i32) {
    %c0_i32 = arith.constant 0 : i32
    %c0_i32_0 = arith.constant 0 : i32
    return %arg0, %c0_i32 : i32, i32
  }
  func.func @transform_1(%arg0: i32) -> (i32, i32) {
    %c0_i32 = arith.constant 0 : i32
    %c0_i32_0 = arith.constant 0 : i32
    return %arg0, %c0_i32 : i32, i32
  }
  func.func @transform_2(%arg0: i32) -> (i32, i32) {
    %c0_i32 = arith.constant 0 : i32
    %c0_i32_0 = arith.constant 0 : i32
    %c0_i32_1 = arith.constant 0 : i32
    return %c0_i32, %c0_i32_0 : i32, i32
  }
  func.func @transform_3(%arg0: i32) -> (i32, i32) {
    %c0_i32 = arith.constant 0 : i32
    %c0_i32_0 = arith.constant 0 : i32
    %c0_i32_1 = arith.constant 0 : i32
    return %c0_i32, %c0_i32_0 : i32, i32
  }
  func.func @transform_4(%arg0: i32) -> (i32, i32) {
    %c0_i32 = arith.constant 0 : i32
    %c0_i32_0 = arith.constant 0 : i32
    %c0_i32_1 = arith.constant 0 : i32
    return %c0_i32, %c0_i32_0 : i32, i32
  }
  func.func @transform_5(%arg0: i32) -> (i32, i32) {
    %c0_i32 = arith.constant 0 : i32
    %c0_i32_0 = arith.constant 0 : i32
    %c0_i32_1 = arith.constant 0 : i32
    return %c0_i32, %c0_i32_0 : i32, i32
  }
  func.func @transform_6(%arg0: i32) -> (i32, i32) {
    %c0_i32 = arith.constant 0 : i32
    %c0_i32_0 = arith.constant 0 : i32
    return %arg0, %c0_i32 : i32, i32
  }
}

</mosaic_0001>

<bundles_post_ra>
// kernel: tpu_custom_call.1
= control target key start
LH: loop header
LB: loop body
LE: loop exit
PB: predicated region body
PF: predicated region fallthrough
CT: control target
= control target key end

     0   :  { %v542_v1 = vmov 1   ;;  %v543_v2 = vmov 0   ;;  %v544_v4 = vmov 0.0   ;;  %s680_s0 = inlined_call_operand.vmem [shape: s32[16,8], index: 0, kind: input, shape index: {}]   ;;  %s681_s1 = inlined_call_operand.vmem [shape: f32[16,1], index: 1, kind: input, shape index: {}]   ;;  %s682_s2 = inlined_call_operand.vmem [shape: bf16[128,16], index: 2, kind: input, shape index: {}]   ;;  %s683_s3 = inlined_call_operand.vmem [shape: bf16[16,128], index: 3, kind: input, shape index: {}]   ;;  %s684_s4 = inlined_call_operand.vmem [shape: bf16[16,128], index: 4, kind: input, shape index: {}]   ;;  %s685_s5 = inlined_call_operand.vmem [shape: f32[1,128], index: 5, kind: input, shape index: {}]   ;;  %s686_s6 = inlined_call_operand.hbm [shape: f32[8,128], index: 6, kind: output, shape index: {}]  }
   0x1   :  { %v27_v0 = vld [vmem:[%s680_s0] sm:$0xff]  ;;  %487 = vset.pattern.permute.xlu1 %v542_v1  ;;  %486 = vset.pattern.permute.xlu0 %v543_v2  ;;  %v28_v3 = vld [vmem:[%s680_s0 + $0x8] sm:$0xff] }
   0x2   :  { %44 = vperm.xlu1 %487, %v27_v0   ;;  %30 = vperm.xlu0 %486, %v27_v0  }
   0x3   :  { %443 = vmatprep.subr.bf16.mxu0 %v544_v4  ;;  %463 = vmatprep.subr.bf16.mxu1 %v544_v4 }
   0x6   :  { %47 = vperm.xlu1 %487, %v28_v3   ;;  %33 = vperm.xlu0 %486, %v28_v3  }
   0x7   :  { %11 = vsyncpa [#allocation3], 0  ;;  %v545_v5 = vmov 2   ;;  %v546_v6 = vmov 3   ;;  %v500_v7 = vld [vmem:[%s682_s2] sm:$0xff]   ;;  %v547_v8 = vmov 4   ;;  %v25_v27 = vlaneseq }
   0x8   :  { %444 = vmatpush3.bf16.msra.mxu0 %v500_v7  ;;  %v548_v9 = vmov 5   ;;  %v501_v10 = vld [vmem:[%s682_s2 + $0x8] sm:$0xff]   ;;  %v549_v11 = vmov 6   ;;  %v502_v12 = vld [vmem:[%s682_s2 + $0x10] sm:$0xff]   ;;  %v503_v13 = vld [vmem:[%s682_s2 + $0x18] sm:$0xff]   ;;  %v550_v16 = vmov 7  }
   0x9   :  { %445 = vmatprep.subr.bf16.mxu0 %v544_v4  ;;  %v504_v14 = vld [vmem:[%s682_s2 + $0x20] sm:$0xff]   ;;  %v505_v15 = vld [vmem:[%s682_s2 + $0x28] sm:$0xff]   ;;  %v506_v17 = vld [vmem:[%s682_s2 + $0x30] sm:$0xff]   ;;  %vm551_vm0 = vmmov 0   ;;  %v26_v30 = vand.u32 127, %v25_v27 }
   0xa   :  { %489 = vset.pattern.permute.xlu1 %v545_v5  ;;  %488 = vset.pattern.permute.xlu0 %v545_v5  ;;  %v507_v18 = vld [vmem:[%s682_s2 + $0x38] sm:$0xff]   ;;  %v247_v19 = vld [vmem:[%s681_s1] sm:$0xff]  ;;  %v248_v20 = vld [vmem:[%s681_s1 + $0x8] sm:$0xff] }
   0xb   :  { %61 = vperm.xlu1 %489, %v28_v3   ;;  %58 = vperm.xlu0 %488, %v27_v0   ;;  %v508_v7 = vld [vmem:[%s684_s4] sm:$0xff]  }
   0xc   :  { %446 = vmatpush3.bf16.msra.mxu0 %v501_v10  ;;  %459 = vmatprep.mubr.msk.bf16.mxu0 %vm551_vm0, %v544_v4 }
   0xd   :  { %447 = vmatprep.subr.bf16.mxu0 %v544_v4  ;;  %465 = vmatprep.mubr.msk.bf16.mxu1 %vm551_vm0, %v544_v4 }
   0xe   :  { %464 = vmatpush3.bf16.msra.mxu1 %v508_v7 }
   0xf   :  { %490 = vset.pattern.permute.xlu1 %v546_v6  ;;  %491 = vset.pattern.permute.xlu0 %v546_v6 }
  0x10   :  { %72 = vperm.xlu1 %490, %v27_v0   ;;  %75 = vperm.xlu0 %491, %v28_v3  }
  0x11   :  { %448 = vmatpush3.bf16.msra.mxu0 %v502_v12  ;;  %469 = vmatprep.subr.bf16.mxu1 %v544_v4 }
  0x12   :  { %449 = vmatprep.subr.bf16.mxu0 %v544_v4 }
  0x14   :  { %492 = vset.pattern.permute.xlu1 %v547_v8  ;;  %493 = vset.pattern.permute.xlu0 %v548_v9 }
  0x15   :  { %86 = vperm.xlu1 %492, %v27_v0   ;;  %100 = vperm.xlu0 %493, %v27_v0  }
  0x16   :  { %450 = vmatpush3.bf16.msra.mxu0 %v503_v13 }
  0x17   :  { %451 = vmatprep.subr.bf16.mxu0 %v544_v4 }
  0x19   :  { %89 = vperm.xlu1 %492, %v28_v3   ;;  %496 = vset.pattern.permute.xlu0 %v549_v11 }
  0x1a   :  { %117 = vperm.xlu0 %496, %v28_v3   ;;  %452 = vmatpush3.bf16.msra.mxu0 %v504_v14 }
  0x1b   :  { %453 = vmatprep.subr.bf16.mxu0 %v544_v4 }
  0x1d   :  { %494 = vset.pattern.permute.xlu1 %v548_v9 }
  0x1e   :  { %103 = vperm.xlu1 %494, %v28_v3   ;;  %498 = vset.pattern.permute.xlu0 %v543_v2 }
  0x1f   :  { %454 = vmatpush3.bf16.msra.mxu0 %v505_v15  ;;  %256 = vperm.xlu0 %498, %v248_v20  }
  0x20   :  { %455 = vmatprep.subr.bf16.mxu0 %v544_v4 }
  0x22   :  { %495 = vset.pattern.permute.xlu1 %v549_v11 }
  0x23   :  { %114 = vperm.xlu1 %495, %v27_v0   ;;  %456 = vmatpush3.bf16.msra.mxu0 %v506_v17 }
  0x24   :  { %457 = vmatprep.subr.bf16.mxu0 %v544_v4 }
  0x27   :  { %497 = vset.pattern.permute.xlu1 %v550_v16  ;;  %458 = vmatpush3.bf16.msra.mxu0 %v507_v18  ;;  %v509_v16 = vld [vmem:[%s683_s3] sm:$0xff]   ;;  %s552_s3 = smov [#allocation2]  }
  0x28   :  { %128 = vperm.xlu1 %497, %v27_v0   ;;  %s393_s23 = sshll.u32 %s552_s3, 4  ;;  %s394_s23 = int_to_ptr.vmem [resolvable:$true] %s393_s23 }
  0x29   :  { %p523_p1 = scmp.lt.s32.totalorder %s394_s23, %s394_s23 }
  0x2c   :  { %131 = vperm.xlu1 %497, %v28_v3  }
  0x30   :  { %499 = vset.pattern.permute.xlu1 %v543_v2 }
  0x31   :  { %251 = vperm.xlu1 %499, %v247_v19  }
  0x81   :  { %v45_v21 = vpop.permute.xlu1 %44  ;;  %v31_v23 = vpop.permute.xlu0 %30 }
  0x82   :  { %vm49_vm1 = vcmp.eq.s32.totalorder %v45_v21, %v26_v30  ;;  %vm35_vm2 = vcmp.eq.s32.totalorder %v31_v23, %v26_v30 }
  0x83   :  { %v403_v33 = vsel %vm49_vm1, 1.0, %v544_v4  ;;  %v401_v34 = vsel %vm35_vm2, 1.0, %v544_v4  ;;  %vm275_vm2 = vcmask 130048  }
  0x84   :  { %v55_v41 = vadd.f32 %v403_v33, %v401_v34 }
  0x85   :  { %v48_v22 = vpop.permute.xlu1 %47  ;;  %v34_v25 = vpop.permute.xlu0 %33 }
  0x86   :  { %vm50_vm3 = vcmp.eq.s32.totalorder %v48_v22, %v26_v30  ;;  %vm36_vm4 = vcmp.eq.s32.totalorder %v34_v25, %v26_v30 }
  0x87   :  { %v404_v35 = vsel %vm50_vm3, 1.0, %v544_v4  ;;  %v402_v36 = vsel %vm36_vm4, 1.0, %v544_v4 }
  0x88   :  { %v56_v42 = vadd.f32 %v404_v35, %v402_v36 }
  0x8a   :  { %v62_v24 = vpop.permute.xlu1 %61  ;;  %v59_v29 = vpop.permute.xlu0 %58 }
  0x8b   :  { %vm64_vm5 = vcmp.eq.s32.totalorder %v62_v24, %v26_v30  ;;  %vm63_vm6 = vcmp.eq.s32.totalorder %v59_v29, %v26_v30 }
  0x8c   :  { %v406_v38 = vsel %vm64_vm5, 1.0, %v544_v4  ;;  %v405_v39 = vsel %vm63_vm6, 1.0, %v544_v4 }
  0x8d   :  { %v70_v45 = vadd.f32 %v406_v38, %v56_v42  ;;  %v69_v46 = vadd.f32 %v405_v39, %v55_v41 }
  0x8f   :  { %v73_v26 = vpop.permute.xlu1 %72  ;;  %v76_v32 = vpop.permute.xlu0 %75 }
  0x90   :  { %vm77_vm7 = vcmp.eq.s32.totalorder %v73_v26, %v26_v30  ;;  %vm78_vm8 = vcmp.eq.s32.totalorder %v76_v32, %v26_v30  ;;  %v429_v26 = vld [vmem:[%s685_s5] ss:$0 sm:$0xff]  ;;  %s518_s5 = scalar_lea.vmem %s394_s23, 128 }
  0x91   :  { %v407_v43 = vsel %vm77_vm7, 1.0, %v544_v4  ;;  %v408_v44 = vsel %vm78_vm8, 1.0, %v544_v4  ;;  %p519_p0 = scmp.ne.s32.totalorder %s394_s23, %s518_s5  ;;  %p524_p2 = scmp.lt.s32.totalorder %s518_s5, %s518_s5 }
  0x92   :  { %v83_v51 = vadd.f32 %v407_v43, %v69_v46  ;;  %v84_v52 = vadd.f32 %v408_v44, %v70_v45 }
  0x93   :  { %p525_p3 = por %p524_p2, %p523_p1 }
  0x94   :  { %v87_v28 = vpop.permute.xlu1 %86  ;;  %v101_v40 = vpop.permute.xlu0 %100 }
  0x95   :  { %vm91_vm9 = vcmp.eq.s32.totalorder %v87_v28, %v26_v30  ;;  %vm105_vm12 = vcmp.eq.s32.totalorder %v101_v40, %v26_v30  ;;  %p526_p4 = pnand %p525_p3, %p519_p0 }
  0x96   :  { %v409_v48 = vsel %vm91_vm9, 1.0, %v544_v4  ;;  %v411_v56 = vsel %vm105_vm12, 1.0, %v544_v4 }
  0x97   :  { %v97_v54 = vadd.f32 %v409_v48, %v83_v51 }
  0x98   :  { %v90_v31 = vpop.permute.xlu1 %89 }
  0x99   :  { %vm92_vm10 = vcmp.eq.s32.totalorder %v90_v31, %v26_v30  ;;  %v118_v50 = vpop.permute.xlu0 %117  ;;  %v111_v61 = vadd.f32 %v411_v56, %v97_v54 }
  0x9a   :  { %v410_v49 = vsel %vm92_vm10, 1.0, %v544_v4  ;;  %vm120_vm13 = vcmp.eq.s32.totalorder %v118_v50, %v26_v30 }
  0x9b   :  { %v98_v55 = vadd.f32 %v410_v49, %v84_v52  ;;  %v414_v59 = vsel %vm120_vm13, 1.0, %v544_v4 }
  0x9d   :  { %v104_v37 = vpop.permute.xlu1 %103 }
  0x9e   :  { %vm106_vm11 = vcmp.eq.s32.totalorder %v104_v37, %v26_v30  ;;  %v257_v8 = vpop.permute.xlu0 %256 }
  0x9f   :  { %v412_v53 = vsel %vm106_vm11, 1.0, %v544_v4  ;;  %510 = vrcp.f32 %v257_v8 }
  0xa0   :  { %v112_v58 = vadd.f32 %v412_v53, %v98_v55 }
  0xa2   :  { %v115_v47 = vpop.permute.xlu1 %114  ;;  %v126_v0 = vadd.f32 %v414_v59, %v112_v58 }
  0xa3   :  { %vm119_vm14 = vcmp.eq.s32.totalorder %v115_v47, %v26_v30 }
  0xa4   :  { %v413_v60 = vsel %vm119_vm14, 1.0, %v544_v4 }
  0xa5   :  { %v125_v1 = vadd.f32 %v413_v60, %v111_v61 }
  0xa7   :  { %v129_v57 = vpop.permute.xlu1 %128 }
  0xa8   :  { %vm133_vm15 = vcmp.eq.s32.totalorder %v129_v57, %v26_v30 }
  0xa9   :  { %v415_v62 = vsel %vm133_vm15, 1.0, %v544_v4  ;;  %v511_v10 = vpop.eup %510 }
  0xaa   :  { %v139_v3 = vadd.f32 %v415_v62, %v125_v1 }
  0xab   :  { %v132_v63 = vpop.permute.xlu1 %131 }
  0xac   :  { %vm134_vm1 = vcmp.eq.s32.totalorder %v132_v63, %v26_v30 }
  0xad   :  { %v416_v2 = vsel %vm134_vm1, 1.0, %v544_v4 }
  0xae   :  { %v140_v5 = vadd.f32 %v416_v2, %v126_v0 }
  0xb0   :  { %v141_v6 = vpack.c.bf16 %v140_v5, %v139_v3  ;;  %v252_v9 = vpop.permute.xlu1 %251 }
  0xb1   :  { %512 = vrcp.f32 %v252_v9 }
  0xb2   :  { %460 = vmatmul.mubr.bf16.vlgmr.msra.gmra.mrb[0].mxu0 %v141_v6 }
  0xbb   :  { %v513_v18 = vpop.eup %512 }
 0x185   :  { %v240_v11 = vpop.f32.mrb[0].mxu0 }
 0x186   :  { %v461_v12 = vpop.f32.mrb[1].mxu0  ;;  %v260_v19 = vmul.f32 %v513_v18, %v240_v11 }
 0x187   :  { %v243_v13 = vpop.f32.mrb[2].mxu0 }
 0x188   :  { %v262_v14 = vmul.f32 %v511_v10, %v243_v13  ;;  %v462_v15 = vpop.f32.mrb[3].mxu0  ;;  %v263_v20 = vpack.c.bf16 %v260_v19, %v260_v19 }
 0x18a   :  { %v266_v17 = vpack.c.bf16 %v262_v14, %v262_v14 }
 0x18c   :  { %466 = vmatmul.mubr.msk.bf16.vlgmr.msra.gmra.mrb[0].mxu1 %vm275_vm2, %v266_v17 }
 0x18d   :  { %470 = vmatpush3.bf16.msra.mxu1 %v509_v16  ;;  %471 = vmatprep.mubr.msk.bf16.mxu1 %vm551_vm0, %v544_v4 }
 0x194   :  { %472 = vmatmul.mubr.msk.bf16.vlgmr.msra.gmra.mrb[4].mxu1 %vm275_vm2, %v263_v20 }
 0x25f   :  { %v313_v21 = vpop.f32.mrb[0].mxu1 }
 0x260   :  { %v467_v22 = vpop.f32.mrb[1].mxu1 }
 0x261   :  { %v316_v23 = vpop.f32.mrb[2].mxu1 }
 0x262   :  { %v468_v24 = vpop.f32.mrb[3].mxu1 }
 0x267   :  { %v362_v25 = vpop.f32.mrb[4].mxu1 }
 0x268   :  { %v363_v27 = vadd.f32 %v362_v25, %v313_v21  ;;  %v473_v28 = vpop.f32.mrb[5].mxu1 }
 0x269   :  { %v365_v29 = vpop.f32.mrb[6].mxu1 }
 0x26a   :  { %v474_v30 = vpop.f32.mrb[7].mxu1  ;;  %v375_v31 = vadd.f32 %v429_v26, %v363_v27 }
 0x26c   :  { %376 = vmax.xlane.f32.xlu1 %v375_v31 }
 0x2f9   :  { %v377_v32 = vpop.xlane.xlu1 %376 }
 0x2fa   :  { %v378_v4 = vsub.f32 %v375_v31, %v377_v32 }
 0x2fc   :  { %v379_v33 = vmul.f32 1.442695, %v378_v4 }
 0x2fe   :  { %514 = vpow2.f32 %v379_v33 }
 0x308   :  { %v515_v34 = vpop.eup %514 }
 0x309   :  { %381 = vadd.xlane.f32.xlu0 %v515_v34 }
 0x396   :  { %v382_v35 = vpop.xlane.xlu0 %381 }
 0x397   :  { %516 = vlog2.f32 %v382_v35 }
 0x3a1   :  { %v517_v36 = vpop.eup %516 }
 0x3a2   :  { %v384_v37 = vmul.f32 0.6931472, %v517_v36 }
 0x3a4   :  { %v385_v38 = vsub.f32 %v378_v4, %v384_v37 }
 0x3a6   :  { %386 = vst [vmem:[#allocation2] sm:$0xff] %v385_v38 }
 0x3a7   :  { %529 = shalt.err (!%p526_p4)
}
 0x3a8   :  { %s530_s0 = scalar_lea.hbm %s686_s6, 128 }
 0x3a9   :  { %p531_p5 = scmp.ne.s32.totalorder %s686_s6, %s530_s0  ;;  %p534_p6 = scmp.lt.u32.totalorder %s530_s0, %s686_s6 }
 0x3ab   :  { %p536_p7 = pnand %p534_p6, %p531_p5 }
 0x3ad   :  { %539 = shalt.err (!%p536_p7)
}
 0x3ae   :  { %396 = dma.vmem_to_hbm [thread:$0]  %s394_s23, 128, %s686_s6, [#allocation3]  }
 0x3af   :  { %540 = dma.done.wait [#allocation3], 128  }
 0x3b0   :  { %541 = vsyncadd [#allocation3], 4294967168 }
 0x3b1   :  { %400 = vsyncpa [#allocation3], 1 }

// kernel: tpu_custom_call.1
= control target key start
LH: loop header
LB: loop body
LE: loop exit
PB: predicated region body
PF: predicated region fallthrough
CT: control target
= control target key end

     0   :  { %v542_v1 = vmov 1   ;;  %v543_v2 = vmov 0   ;;  %v544_v4 = vmov 0.0   ;;  %s680_s0 = inlined_call_operand.vmem [shape: s32[16,8], index: 0, kind: input, shape index: {}]   ;;  %s681_s1 = inlined_call_operand.vmem [shape: f32[16,1], index: 1, kind: input, shape index: {}]   ;;  %s682_s2 = inlined_call_operand.vmem [shape: bf16[128,16], index: 2, kind: input, shape index: {}]   ;;  %s683_s3 = inlined_call_operand.vmem [shape: bf16[16,128], index: 3, kind: input, shape index: {}]   ;;  %s684_s4 = inlined_call_operand.vmem [shape: bf16[16,128], index: 4, kind: input, shape index: {}]   ;;  %s685_s5 = inlined_call_operand.vmem [shape: f32[1,128], index: 5, kind: input, shape index: {}]   ;;  %s686_s6 = inlined_call_operand.hbm [shape: f32[8,128], index: 6, kind: output, shape index: {}]  }
   0x1   :  { %v27_v0 = vld [vmem:[%s680_s0] sm:$0xff]  ;;  %487 = vset.pattern.permute.xlu1 %v542_v1  ;;  %486 = vset.pattern.permute.xlu0 %v543_v2  ;;  %v28_v3 = vld [vmem:[%s680_s0 + $0x8] sm:$0xff] }
   0x2   :  { %44 = vperm.xlu1 %487, %v27_v0   ;;  %30 = vperm.xlu0 %486, %v27_v0  }
   0x3   :  { %443 = vmatprep.subr.bf16.mxu0 %v544_v4  ;;  %463 = vmatprep.subr.bf16.mxu1 %v544_v4 }
   0x6   :  { %47 = vperm.xlu1 %487, %v28_v3   ;;  %33 = vperm.xlu0 %486, %v28_v3  }
   0x7   :  { %11 = vsyncpa [#allocation3], 0  ;;  %v545_v5 = vmov 2   ;;  %v546_v6 = vmov 3   ;;  %v500_v7 = vld [vmem:[%s682_s2] sm:$0xff]   ;;  %v547_v8 = vmov 4   ;;  %v25_v27 = vlaneseq }
   0x8   :  { %444 = vmatpush3.bf16.msra.mxu0 %v500_v7  ;;  %v548_v9 = vmov 5   ;;  %v501_v10 = vld [vmem:[%s682_s2 + $0x8] sm:$0xff]   ;;  %v549_v11 = vmov 6   ;;  %v502_v12 = vld [vmem:[%s682_s2 + $0x10] sm:$0xff]   ;;  %v503_v13 = vld [vmem:[%s682_s2 + $0x18] sm:$0xff]   ;;  %v550_v16 = vmov 7  }
   0x9   :  { %445 = vmatprep.subr.bf16.mxu0 %v544_v4  ;;  %v504_v14 = vld [vmem:[%s682_s2 + $0x20] sm:$0xff]   ;;  %v505_v15 = vld [vmem:[%s682_s2 + $0x28] sm:$0xff]   ;;  %v506_v17 = vld [vmem:[%s682_s2 + $0x30] sm:$0xff]   ;;  %vm551_vm0 = vmmov 0   ;;  %v26_v30 = vand.u32 127, %v25_v27 }
   0xa   :  { %489 = vset.pattern.permute.xlu1 %v545_v5  ;;  %488 = vset.pattern.permute.xlu0 %v545_v5  ;;  %v507_v18 = vld [vmem:[%s682_s2 + $0x38] sm:$0xff]   ;;  %v247_v19 = vld [vmem:[%s681_s1] sm:$0xff]  ;;  %v248_v20 = vld [vmem:[%s681_s1 + $0x8] sm:$0xff] }
   0xb   :  { %61 = vperm.xlu1 %489, %v28_v3   ;;  %58 = vperm.xlu0 %488, %v27_v0   ;;  %v508_v7 = vld [vmem:[%s684_s4] sm:$0xff]  }
   0xc   :  { %446 = vmatpush3.bf16.msra.mxu0 %v501_v10  ;;  %459 = vmatprep.mubr.msk.bf16.mxu0 %vm551_vm0, %v544_v4 }
   0xd   :  { %447 = vmatprep.subr.bf16.mxu0 %v544_v4  ;;  %465 = vmatprep.mubr.msk.bf16.mxu1 %vm551_vm0, %v544_v4 }
   0xe   :  { %464 = vmatpush3.bf16.msra.mxu1 %v508_v7 }
   0xf   :  { %490 = vset.pattern.permute.xlu1 %v546_v6  ;;  %491 = vset.pattern.permute.xlu0 %v546_v6 }
  0x10   :  { %72 = vperm.xlu1 %490, %v27_v0   ;;  %75 = vperm.xlu0 %491, %v28_v3  }
  0x11   :  { %448 = vmatpush3.bf16.msra.mxu0 %v502_v12  ;;  %469 = vmatprep.subr.bf16.mxu1 %v544_v4 }
  0x12   :  { %449 = vmatprep.subr.bf16.mxu0 %v544_v4 }
  0x14   :  { %492 = vset.pattern.permute.xlu1 %v547_v8  ;;  %493 = vset.pattern.permute.xlu0 %v548_v9 }
  0x15   :  { %86 = vperm.xlu1 %492, %v27_v0   ;;  %100 = vperm.xlu0 %493, %v27_v0  }
  0x16   :  { %450 = vmatpush3.bf16.msra.mxu0 %v503_v13 }
  0x17   :  { %451 = vmatprep.subr.bf16.mxu0 %v544_v4 }
  0x19   :  { %89 = vperm.xlu1 %492, %v28_v3   ;;  %496 = vset.pattern.permute.xlu0 %v549_v11 }
  0x1a   :  { %117 = vperm.xlu0 %496, %v28_v3   ;;  %452 = vmatpush3.bf16.msra.mxu0 %v504_v14 }
  0x1b   :  { %453 = vmatprep.subr.bf16.mxu0 %v544_v4 }
  0x1d   :  { %494 = vset.pattern.permute.xlu1 %v548_v9 }
  0x1e   :  { %103 = vperm.xlu1 %494, %v28_v3   ;;  %498 = vset.pattern.permute.xlu0 %v543_v2 }
  0x1f   :  { %454 = vmatpush3.bf16.msra.mxu0 %v505_v15  ;;  %256 = vperm.xlu0 %498, %v248_v20  }
  0x20   :  { %455 = vmatprep.subr.bf16.mxu0 %v544_v4 }
  0x22   :  { %495 = vset.pattern.permute.xlu1 %v549_v11 }
  0x23   :  { %114 = vperm.xlu1 %495, %v27_v0   ;;  %456 = vmatpush3.bf16.msra.mxu0 %v506_v17 }
  0x24   :  { %457 = vmatprep.subr.bf16.mxu0 %v544_v4 }
  0x27   :  { %497 = vset.pattern.permute.xlu1 %v550_v16  ;;  %458 = vmatpush3.bf16.msra.mxu0 %v507_v18  ;;  %v509_v16 = vld [vmem:[%s683_s3] sm:$0xff]   ;;  %s552_s3 = smov [#allocation2]  }
  0x28   :  { %128 = vperm.xlu1 %497, %v27_v0   ;;  %s393_s23 = sshll.u32 %s552_s3, 4  ;;  %s394_s23 = int_to_ptr.vmem [resolvable:$true] %s393_s23 }
  0x29   :  { %p523_p1 = scmp.lt.s32.totalorder %s394_s23, %s394_s23 }
  0x2c   :  { %131 = vperm.xlu1 %497, %v28_v3  }
  0x30   :  { %499 = vset.pattern.permute.xlu1 %v543_v2 }
  0x31   :  { %251 = vperm.xlu1 %499, %v247_v19  }
  0x81   :  { %v45_v21 = vpop.permute.xlu1 %44  ;;  %v31_v23 = vpop.permute.xlu0 %30 }
  0x82   :  { %vm49_vm1 = vcmp.eq.s32.totalorder %v45_v21, %v26_v30  ;;  %vm35_vm2 = vcmp.eq.s32.totalorder %v31_v23, %v26_v30 }
  0x83   :  { %v403_v33 = vsel %vm49_vm1, 1.0, %v544_v4  ;;  %v401_v34 = vsel %vm35_vm2, 1.0, %v544_v4  ;;  %vm275_vm2 = vcmask 130048  }
  0x84   :  { %v55_v41 = vadd.f32 %v403_v33, %v401_v34 }
  0x85   :  { %v48_v22 = vpop.permute.xlu1 %47  ;;  %v34_v25 = vpop.permute.xlu0 %33 }
  0x86   :  { %vm50_vm3 = vcmp.eq.s32.totalorder %v48_v22, %v26_v30  ;;  %vm36_vm4 = vcmp.eq.s32.totalorder %v34_v25, %v26_v30 }
  0x87   :  { %v404_v35 = vsel %vm50_vm3, 1.0, %v544_v4  ;;  %v402_v36 = vsel %vm36_vm4, 1.0, %v544_v4 }
  0x88   :  { %v56_v42 = vadd.f32 %v404_v35, %v402_v36 }
  0x8a   :  { %v62_v24 = vpop.permute.xlu1 %61  ;;  %v59_v29 = vpop.permute.xlu0 %58 }
  0x8b   :  { %vm64_vm5 = vcmp.eq.s32.totalorder %v62_v24, %v26_v30  ;;  %vm63_vm6 = vcmp.eq.s32.totalorder %v59_v29, %v26_v30 }
  0x8c   :  { %v406_v38 = vsel %vm64_vm5, 1.0, %v544_v4  ;;  %v405_v39 = vsel %vm63_vm6, 1.0, %v544_v4 }
  0x8d   :  { %v70_v45 = vadd.f32 %v406_v38, %v56_v42  ;;  %v69_v46 = vadd.f32 %v405_v39, %v55_v41 }
  0x8f   :  { %v73_v26 = vpop.permute.xlu1 %72  ;;  %v76_v32 = vpop.permute.xlu0 %75 }
  0x90   :  { %vm77_vm7 = vcmp.eq.s32.totalorder %v73_v26, %v26_v30  ;;  %vm78_vm8 = vcmp.eq.s32.totalorder %v76_v32, %v26_v30  ;;  %v429_v26 = vld [vmem:[%s685_s5] ss:$0 sm:$0xff]  ;;  %s518_s5 = scalar_lea.vmem %s394_s23, 128 }
  0x91   :  { %v407_v43 = vsel %vm77_vm7, 1.0, %v544_v4  ;;  %v408_v44 = vsel %vm78_vm8, 1.0, %v544_v4  ;;  %p519_p0 = scmp.ne.s32.totalorder %s394_s23, %s518_s5  ;;  %p524_p2 = scmp.lt.s32.totalorder %s518_s5, %s518_s5 }
  0x92   :  { %v83_v51 = vadd.f32 %v407_v43, %v69_v46  ;;  %v84_v52 = vadd.f32 %v408_v44, %v70_v45 }
  0x93   :  { %p525_p3 = por %p524_p2, %p523_p1 }
  0x94   :  { %v87_v28 = vpop.permute.xlu1 %86  ;;  %v101_v40 = vpop.permute.xlu0 %100 }
  0x95   :  { %vm91_vm9 = vcmp.eq.s32.totalorder %v87_v28, %v26_v30  ;;  %vm105_vm12 = vcmp.eq.s32.totalorder %v101_v40, %v26_v30  ;;  %p526_p4 = pnand %p525_p3, %p519_p0 }
  0x96   :  { %v409_v48 = vsel %vm91_vm9, 1.0, %v544_v4  ;;  %v411_v56 = vsel %vm105_vm12, 1.0, %v544_v4 }
  0x97   :  { %v97_v54 = vadd.f32 %v409_v48, %v83_v51 }
  0x98   :  { %v90_v31 = vpop.permute.xlu1 %89 }
  0x99   :  { %vm92_vm10 = vcmp.eq.s32.totalorder %v90_v31, %v26_v30  ;;  %v118_v50 = vpop.permute.xlu0 %117  ;;  %v111_v61 = vadd.f32 %v411_v56, %v97_v54 }
  0x9a   :  { %v410_v49 = vsel %vm92_vm10, 1.0, %v544_v4  ;;  %vm120_vm13 = vcmp.eq.s32.totalorder %v118_v50, %v26_v30 }
  0x9b   :  { %v98_v55 = vadd.f32 %v410_v49, %v84_v52  ;;  %v414_v59 = vsel %vm120_vm13, 1.0, %v544_v4 }
  0x9d   :  { %v104_v37 = vpop.permute.xlu1 %103 }
  0x9e   :  { %vm106_vm11 = vcmp.eq.s32.totalorder %v104_v37, %v26_v30  ;;  %v257_v8 = vpop.permute.xlu0 %256 }
  0x9f   :  { %v412_v53 = vsel %vm106_vm11, 1.0, %v544_v4  ;;  %510 = vrcp.f32 %v257_v8 }
  0xa0   :  { %v112_v58 = vadd.f32 %v412_v53, %v98_v55 }
  0xa2   :  { %v115_v47 = vpop.permute.xlu1 %114  ;;  %v126_v0 = vadd.f32 %v414_v59, %v112_v58 }
  0xa3   :  { %vm119_vm14 = vcmp.eq.s32.totalorder %v115_v47, %v26_v30 }
  0xa4   :  { %v413_v60 = vsel %vm119_vm14, 1.0, %v544_v4 }
  0xa5   :  { %v125_v1 = vadd.f32 %v413_v60, %v111_v61 }
  0xa7   :  { %v129_v57 = vpop.permute.xlu1 %128 }
  0xa8   :  { %vm133_vm15 = vcmp.eq.s32.totalorder %v129_v57, %v26_v30 }
  0xa9   :  { %v415_v62 = vsel %vm133_vm15, 1.0, %v544_v4  ;;  %v511_v10 = vpop.eup %510 }
  0xaa   :  { %v139_v3 = vadd.f32 %v415_v62, %v125_v1 }
  0xab   :  { %v132_v63 = vpop.permute.xlu1 %131 }
  0xac   :  { %vm134_vm1 = vcmp.eq.s32.totalorder %v132_v63, %v26_v30 }
  0xad   :  { %v416_v2 = vsel %vm134_vm1, 1.0, %v544_v4 }
  0xae   :  { %v140_v5 = vadd.f32 %v416_v2, %v126_v0 }
  0xb0   :  { %v141_v6 = vpack.c.bf16 %v140_v5, %v139_v3  ;;  %v252_v9 = vpop.permute.xlu1 %251 }
  0xb1   :  { %512 = vrcp.f32 %v252_v9 }
  0xb2   :  { %460 = vmatmul.mubr.bf16.vlgmr.msra.gmra.mrb[0].mxu0 %v141_v6 }
  0xbb   :  { %v513_v18 = vpop.eup %512 }
 0x185   :  { %v240_v11 = vpop.f32.mrb[0].mxu0 }
 0x186   :  { %v461_v12 = vpop.f32.mrb[1].mxu0  ;;  %v260_v19 = vmul.f32 %v513_v18, %v240_v11 }
 0x187   :  { %v243_v13 = vpop.f32.mrb[2].mxu0 }
 0x188   :  { %v262_v14 = vmul.f32 %v511_v10, %v243_v13  ;;  %v462_v15 = vpop.f32.mrb[3].mxu0  ;;  %v263_v20 = vpack.c.bf16 %v260_v19, %v260_v19 }
 0x18a   :  { %v266_v17 = vpack.c.bf16 %v262_v14, %v262_v14 }
 0x18c   :  { %466 = vmatmul.mubr.msk.bf16.vlgmr.msra.gmra.mrb[0].mxu1 %vm275_vm2, %v266_v17 }
 0x18d   :  { %470 = vmatpush3.bf16.msra.mxu1 %v509_v16  ;;  %471 = vmatprep.mubr.msk.bf16.mxu1 %vm551_vm0, %v544_v4 }
 0x194   :  { %472 = vmatmul.mubr.msk.bf16.vlgmr.msra.gmra.mrb[4].mxu1 %vm275_vm2, %v263_v20 }
 0x25f   :  { %v313_v21 = vpop.f32.mrb[0].mxu1 }
 0x260   :  { %v467_v22 = vpop.f32.mrb[1].mxu1 }
 0x261   :  { %v316_v23 = vpop.f32.mrb[2].mxu1 }
 0x262   :  { %v468_v24 = vpop.f32.mrb[3].mxu1 }
 0x267   :  { %v362_v25 = vpop.f32.mrb[4].mxu1 }
 0x268   :  { %v363_v27 = vadd.f32 %v362_v25, %v313_v21  ;;  %v473_v28 = vpop.f32.mrb[5].mxu1 }
 0x269   :  { %v365_v29 = vpop.f32.mrb[6].mxu1 }
 0x26a   :  { %v474_v30 = vpop.f32.mrb[7].mxu1  ;;  %v375_v31 = vadd.f32 %v429_v26, %v363_v27 }
 0x26c   :  { %376 = vmax.xlane.f32.xlu1 %v375_v31 }
 0x2f9   :  { %v377_v32 = vpop.xlane.xlu1 %376 }
 0x2fa   :  { %v378_v4 = vsub.f32 %v375_v31, %v377_v32 }
 0x2fc   :  { %v379_v33 = vmul.f32 1.442695, %v378_v4 }
 0x2fe   :  { %514 = vpow2.f32 %v379_v33 }
 0x308   :  { %v515_v34 = vpop.eup %514 }
 0x309   :  { %381 = vadd.xlane.f32.xlu0 %v515_v34 }
 0x396   :  { %v382_v35 = vpop.xlane.xlu0 %381 }
 0x397   :  { %516 = vlog2.f32 %v382_v35 }
 0x3a1   :  { %v517_v36 = vpop.eup %516 }
 0x3a2   :  { %v384_v37 = vmul.f32 0.6931472, %v517_v36 }
 0x3a4   :  { %v385_v38 = vsub.f32 %v378_v4, %v384_v37 }
 0x3a6   :  { %386 = vst [vmem:[#allocation2] sm:$0xff] %v385_v38 }
 0x3a7   :  { %529 = shalt.err (!%p526_p4)
}
 0x3a8   :  { %s530_s0 = scalar_lea.hbm %s686_s6, 128 }
 0x3a9   :  { %p531_p5 = scmp.ne.s32.totalorder %s686_s6, %s530_s0  ;;  %p534_p6 = scmp.lt.u32.totalorder %s530_s0, %s686_s6 }
 0x3ab   :  { %p536_p7 = pnand %p534_p6, %p531_p5 }
 0x3ad   :  { %539 = shalt.err (!%p536_p7)
}
 0x3ae   :  { %396 = dma.vmem_to_hbm [thread:$0]  %s394_s23, 128, %s686_s6, [#allocation3]  }
 0x3af   :  { %540 = dma.done.wait [#allocation3], 128  }
 0x3b0   :  { %541 = vsyncadd [#allocation3], 4294967168 }
 0x3b1   :  { %400 = vsyncpa [#allocation3], 1 }

</bundles_post_ra>
